<compile_context>
chip_gen: v7x
topology: tpu7x:2x2x1
jax: 0.10.0
libtpu: 0.0.40
codegen_flags: <defaults>
</compile_context>

<pallas_src>
import math

import jax
import jax.numpy as jnp
from jax.experimental import pallas as pl
from jax.experimental.pallas import tpu as pltpu


_LANE = 128
_SMALL_FALLBACK_BYTES = 1 * 1024 * 1024
_DESIRED_ROW_STEPS = 4  # keep >=4 grid steps so megacore parts (v7x) split work


def _cdiv(a, b):
    return -(-a // b)


def _round_up(a, b):
    return _cdiv(a, b) * b


def _vmem_limit_bytes():
    """Generation-aware scoped-VMEM budget (<= half of physical VMEM, capped)."""
    try:
        cap = int(pltpu.get_tpu_info().vmem_capacity_bytes)
    except Exception:
        cap = 64 * 1024 * 1024  # conservative: v7x per-TC VMEM
    return int(min(cap // 2, 64 * 1024 * 1024))


def _linear_wise_bias_kernel(x_ref, w_ref, b_ref, o_ref):
    # (tile_b, tile_f) * (1, tile_f) + (1, tile_f): per-feature scale+shift (VPU).
    o_ref[...] = (x_ref[...] * w_ref[...] + b_ref[...]).astype(o_ref.dtype)


def _linear_wise_nobias_kernel(x_ref, w_ref, o_ref):
    o_ref[...] = (x_ref[...] * w_ref[...]).astype(o_ref.dtype)


def linear_wise(x, weight, bias=None, *, force_pallas=False):
    """out = x * weight (+ bias), weight/bias of shape (in_features,)."""
    orig_shape = x.shape
    F = orig_shape[-1]
    assert weight.shape == (F,)
    if bias is not None:
        assert bias.shape == (F,)

    # Compute in x.dtype end-to-end: no in-kernel up/down casts.
    weight = weight.astype(x.dtype)
    if bias is not None:
        bias = bias.astype(x.dtype)

    def _xla_fallback():
        out = x * weight
        if bias is not None:
            out = out + bias
        return out

    itemsize = x.dtype.itemsize
    # Small-input fallback: kernel launch + DMA setup dwarfs the work there.
    if not force_pallas and x.size * itemsize < _SMALL_FALLBACK_BYTES:
        return _xla_fallback()

    x2d = x.reshape(-1, F)
    B = x2d.shape[0]

    # ---- lane-density: fold k rows together ONLY when no pad/slice is needed ---
    # (a wrapper-side jnp.pad + output slice would each add a full extra HBM pass)
    k = 1
    if F % _LANE != 0:
        k_cand = math.lcm(F, _LANE) // F
        if B >= k_cand and B % k_cand == 0:
            k = k_cand
    if k > 1:
        F_eff = k * F
        B_eff = B // k
        x_lane = x2d.reshape(B_eff, F_eff)            # pure metadata reshape
        w_lane = jnp.tile(weight, k).reshape(1, F_eff)
        b_lane = jnp.tile(bias, k).reshape(1, F_eff) if bias is not None else None
    else:
        F_eff = F
        B_eff = B
        x_lane = x2d
        w_lane = weight.reshape(1, F_eff)
        b_lane = bias.reshape(1, F_eff) if bias is not None else None

    vmem_limit = _vmem_limit_bytes()
    # 2x double-buffered x tile + 2x out tile + resident w/b + slack => ~limit/8.
    tile_budget = max(vmem_limit // 8, 512 * 1024)

    # Dtype-aware sublane rounding (bf16 packs 16 rows / vreg, int8/fp8 packs 32).
    sublane = max(8, (8 * 4) // itemsize)

    lane_dense = (F_eff % _LANE == 0)

    # ---- feature-axis tiling (only possible on a lane-dense last dim) ----------
    if lane_dense and F_eff * sublane * itemsize > tile_budget:
        max_lanes = (tile_budget // (sublane * itemsize)) // _LANE * _LANE
        tile_f = max(_LANE, min(F_eff, max_lanes))
    else:
        tile_f = F_eff
    if not lane_dense and tile_f * sublane * itemsize > vmem_limit // 5:
        # A single minimal (sublane, F) block would blow scoped VMEM and a
        # non-128-multiple last dim cannot be feature-tiled without pad copies.
        # TODO(synk): in-kernel masked stores over a padded lane dim for this case.
        return _xla_fallback()
    grid_f = _cdiv(F_eff, tile_f)

    # ---- row-axis tiling --------------------------------------------------------
    if B_eff <= sublane:
        tile_b = B_eff  # full-extent row block (legal even if < 8)
    else:
        rows = tile_budget // max(1, tile_f * itemsize)
        rows = max(sublane, (rows // sublane) * sublane)
        # Never collapse to a 1-step grid: keep >= _DESIRED_ROW_STEPS steps when
        # possible so both v7x TensorCores get a share of the HBM bandwidth.
        cap = max(sublane, _round_up(_cdiv(B_eff, _DESIRED_ROW_STEPS), sublane))
        tile_b = min(rows, cap)
    grid_b = _cdiv(B_eff, tile_b)
    # NOTE: trailing partial blocks (B_eff % tile_b != 0 or F_eff % tile_f != 0)
    # rely on Pallas discarding out-of-bounds output rows/lanes; this op is
    # elementwise, so reading padded garbage in those slots is harmless.

    cost = pl.CostEstimate(
        flops=2 * B_eff * F_eff,
        transcendentals=0,
        bytes_accessed=2 * B_eff * F_eff * itemsize + 2 * F_eff * itemsize,
    )
    cparams = pltpu.CompilerParams(
        dimension_semantics=("parallel", "parallel"),
        vmem_limit_bytes=vmem_limit,
    )

    x_spec = pl.BlockSpec((tile_b, tile_f), lambda i, j: (i, j))
    vec_spec = pl.BlockSpec((1, tile_f), lambda i, j: (0, j))   # w/b stay resident per column-tile
    out_spec = pl.BlockSpec((tile_b, tile_f), lambda i, j: (i, j))

    if bias is not None:
        out2d = pl.pallas_call(
            _linear_wise_bias_kernel,
            out_shape=jax.ShapeDtypeStruct((B_eff, F_eff), x.dtype),
            grid_spec=pl.GridSpec(
                grid=(grid_b, grid_f),
                in_specs=[x_spec, vec_spec, vec_spec],
                out_specs=out_spec,
            ),
            compiler_params=cparams,
            cost_estimate=cost,
        )(x_lane, w_lane, b_lane)
    else:
        out2d = pl.pallas_call(
            _linear_wise_nobias_kernel,
            out_shape=jax.ShapeDtypeStruct((B_eff, F_eff), x.dtype),
            grid_spec=pl.GridSpec(
                grid=(grid_b, grid_f),
                in_specs=[x_spec, vec_spec],
                out_specs=out_spec,
            ),
            compiler_params=cparams,
            cost_estimate=cost,
        )(x_lane, w_lane)

    if k > 1:
        out2d = out2d.reshape(B, F)  # contiguous metadata reshape, no copy
    return out2d.reshape(orig_shape)


if __name__ == "__main__":
    key = jax.random.PRNGKey(0)
    batch, in_features = 8, 32

    x = jax.random.normal(key, (batch, in_features), dtype=jnp.float32)

    # Deterministic parameter init mirroring reset_parameters():
    # uniform_(1, 1) fills both weight and bias with the constant 1.0.
    weight = jnp.ones((in_features,), dtype=jnp.float32)
    bias = jnp.ones((in_features,), dtype=jnp.float32)

    # With-bias path (lane folding without any pad: F=32, B=8 -> k=4, B_eff=2).
    out = jax.block_until_ready(linear_wise(x, weight, bias, force_pallas=True))
    ref = x * weight + bias
    assert jnp.allclose(out, ref, atol=1e-6), "mismatch vs reference (bias)"

    # No-bias path (dedicated kernel, no zero-bias DMA).
    out_nb = jax.block_until_ready(linear_wise(x, weight, None, force_pallas=True))
    assert jnp.allclose(out_nb, x * weight, atol=1e-6), "mismatch vs reference (no bias)"

    # Lane-dense path (F multiple of 128) with leading dims: 2-D reshape + row tiling.
    x3 = jax.random.normal(jax.random.PRNGKey(1), (2, 16, 256), dtype=jnp.float32)
    w3 = jax.random.normal(jax.random.PRNGKey(2), (256,), dtype=jnp.float32)
    b3 = jax.random.normal(jax.random.PRNGKey(3), (256,), dtype=jnp.float32)
    out3 = jax.block_until_ready(linear_wise(x3, w3, b3, force_pallas=True))
    assert jnp.allclose(out3, x3 * w3 + b3, atol=1e-6), "mismatch vs reference (3D)"

    # Unfolded ragged path: F % 128 != 0 and B % k != 0 -> full-extent last dim,
    # no pad/slice copies.
    x4 = jax.random.normal(jax.random.PRNGKey(4), (6, 32), dtype=jnp.float32)
    out4 = jax.block_until_ready(linear_wise(x4, weight, bias, force_pallas=True))
    assert jnp.allclose(out4, x4 * weight + bias, atol=1e-6), "mismatch vs reference (ragged)"

    # bf16 path: params cast to x.dtype, dtype-aware sublane tile, explicit out cast.
    x5 = jax.random.normal(jax.random.PRNGKey(5), (16, 256), dtype=jnp.bfloat16)
    out5 = jax.block_until_ready(linear_wise(x5, w3, b3, force_pallas=True))
    ref5 = x5 * w3.astype(jnp.bfloat16) + b3.astype(jnp.bfloat16)
    assert jnp.allclose(out5.astype(jnp.float32), ref5.astype(jnp.float32),
                        atol=1e-2), "mismatch vs reference (bf16)"

    print("KERNEL_OK")
</pallas_src>

<mosaic_0001>
module attributes {stable_mosaic.version = 11 : i64} {
  func.func @_linear_wise_bias_kernel(%arg0: i32, %arg1: i32, %arg2: memref<2x128xf32, #tpu.memory_space<vmem>>, %arg3: memref<1x128xf32, #tpu.memory_space<vmem>>, %arg4: memref<1x128xf32, #tpu.memory_space<vmem>>, %arg5: memref<2x128xf32, #tpu.memory_space<vmem>>) attributes {dimension_semantics = [#tpu.dimension_semantics<parallel>, #tpu.dimension_semantics<parallel>], iteration_bounds = array<i64: 1, 1>, scalar_prefetch = 0 : i64, scratch_operands = 0 : i64, tpu.core_type = #tpu.core_type<tc>, window_params = [{transform_indices = @transform_0, window_bounds = array<i64: 2, 128>}, {transform_indices = @transform_1, window_bounds = array<i64: 1, 128>}, {transform_indices = @transform_2, window_bounds = array<i64: 1, 128>}, {transform_indices = @transform_3, window_bounds = array<i64: 2, 128>}]} {
    %c0 = arith.constant 0 : index
    %c0_0 = arith.constant 0 : index
    %0 = vector.load %arg2[%c0, %c0_0] : memref<2x128xf32, #tpu.memory_space<vmem>>, vector<2x128xf32>
    %c0_1 = arith.constant 0 : index
    %c0_2 = arith.constant 0 : index
    %1 = vector.load %arg3[%c0_1, %c0_2] : memref<1x128xf32, #tpu.memory_space<vmem>>, vector<1x128xf32>
    %2 = vector.broadcast %1 : vector<1x128xf32> to vector<2x128xf32>
    %3 = arith.mulf %0, %2 : vector<2x128xf32>
    %c0_3 = arith.constant 0 : index
    %c0_4 = arith.constant 0 : index
    %4 = vector.load %arg4[%c0_3, %c0_4] : memref<1x128xf32, #tpu.memory_space<vmem>>, vector<1x128xf32>
    %5 = vector.broadcast %4 : vector<1x128xf32> to vector<2x128xf32>
    %6 = arith.addf %3, %5 : vector<2x128xf32>
    %c0_5 = arith.constant 0 : index
    %c0_6 = arith.constant 0 : index
    %7 = vector.load %arg5[%c0_5, %c0_6] : memref<2x128xf32, #tpu.memory_space<vmem>>, vector<2x128xf32>
    tpu.vector_store %arg5[%c0_5, %c0_6], %6 {strides = array<i32>} : memref<2x128xf32, #tpu.memory_space<vmem>>, vector<2x128xf32>,
    return
  }
  func.func @transform_0(%arg0: i32, %arg1: i32) -> (i32, i32) {
    %c0_i32 = arith.constant 0 : i32
    return %arg0, %arg1 : i32, i32
  }
  func.func @transform_1(%arg0: i32, %arg1: i32) -> (i32, i32) {
    %c0_i32 = arith.constant 0 : i32
    %c0_i32_0 = arith.constant 0 : i32
    return %c0_i32, %arg1 : i32, i32
  }
  func.func @transform_2(%arg0: i32, %arg1: i32) -> (i32, i32) {
    %c0_i32 = arith.constant 0 : i32
    %c0_i32_0 = arith.constant 0 : i32
    return %c0_i32, %arg1 : i32, i32
  }
  func.func @transform_3(%arg0: i32, %arg1: i32) -> (i32, i32) {
    %c0_i32 = arith.constant 0 : i32
    return %arg0, %arg1 : i32, i32
  }
}

</mosaic_0001>

<bundles_post_ra>
// kernel: tpu_custom_call.1
= control target key start
LH: loop header
LB: loop body
LE: loop exit
PB: predicated region body
PF: predicated region fallthrough
CT: control target
= control target key end

     0   :  { %8 = vsyncpa [#allocation3], 0  ;;  %s164_s0 = inlined_call_operand.hbm [shape: f32[2,128], index: 0, kind: input, shape index: {}]   ;;  %s165_s1 = inlined_call_operand.vmem [shape: f32[1,128], index: 1, kind: input, shape index: {}]   ;;  %s166_s2 = inlined_call_operand.vmem [shape: f32[1,128], index: 2, kind: input, shape index: {}]   ;;  %s167_s3 = inlined_call_operand.hbm [shape: f32[2,128], index: 3, kind: output, shape index: {}]  }
   0x1   :  { %9 = vsyncpa [#allocation4], 0  ;;  %s112_s12 = smov [#allocation2]   ;;  %s64_s16 = scalar_lea.hbm %s164_s0, 32 }
   0x2   :  { %s16_s13 = sshll.u32 %s112_s12, 4  ;;  %p65_p0 = scmp.ne.s32.totalorder %s164_s0, %s64_s16  ;;  %s17_s13 = int_to_ptr.vmem [resolvable:$true] %s16_s13 }
   0x3   :  { %p68_p1 = scmp.lt.u32.totalorder %s64_s16, %s164_s0 }
   0x5   :  { %p70_p2 = pnand %p68_p1, %p65_p0 }
   0x7   :  { %73 = shalt.err (!%p70_p2)
}
   0x8   :  { %s74_s21 = scalar_lea.vmem %s17_s13, 32  ;;  %p79_p4 = scmp.lt.s32.totalorder %s17_s13, %s17_s13 }
   0x9   :  { %p75_p3 = scmp.ne.s32.totalorder %s17_s13, %s74_s21  ;;  %p80_p5 = scmp.lt.s32.totalorder %s74_s21, %s74_s21 }
   0xb   :  { %p81_p6 = por %p80_p5, %p79_p4 }
   0xd   :  { %p82_p7 = pnand %p81_p6, %p75_p3 }
   0xf   :  { %85 = shalt.err (!%p82_p7)
}
  0x10   :  { %19 = dma.hbm_to_vmem [thread:$0]  %s164_s0, 32, %s17_s13, [#allocation3]  }
  0x11   :  { %108 = dma.done.wait [#allocation3], 32  }
  0x12   :  { %109 = vsyncadd [#allocation3], 4294967264  ;;  %s113_s24 = smov [#allocation5]   ;;  %v27_v0 = vld [vmem:[#allocation2] sm:$0x3] }
  0x13   :  { %s51_s25 = sshll.u32 %s113_s24, 4  ;;  %v60_v1 = vld [vmem:[%s165_s1] ss:$0 sm:$0xff]  ;;  %s52_s25 = int_to_ptr.vmem [resolvable:$true] %s51_s25 }
  0x14   :  { %v61_v2 = vld [vmem:[%s166_s2] ss:$0 sm:$0xff]  ;;  %v35_v3 = vmul.f32 %v60_v1, %v27_v0  ;;  %s86_s30 = scalar_lea.vmem %s52_s25, 32  ;;  %p91_p9 = scmp.lt.s32.totalorder %s52_s25, %s52_s25 }
  0x15   :  { %p87_p8 = scmp.ne.s32.totalorder %s52_s25, %s86_s30  ;;  %p92_p10 = scmp.lt.s32.totalorder %s86_s30, %s86_s30 }
  0x16   :  { %v43_v4 = vadd.f32 %v61_v2, %v35_v3 }
  0x17   :  { %p93_p11 = por %p92_p10, %p91_p9 }
  0x18   :  { %44 = vst [vmem:[#allocation5] sm:$0x3] %v43_v4 }
  0x19   :  { %p94_p12 = pnand %p93_p11, %p87_p8 }
  0x1b   :  { %97 = shalt.err (!%p94_p12)
}
  0x1c   :  { %s98_s5 = scalar_lea.hbm %s167_s3, 32 }
  0x1d   :  { %p99_p13 = scmp.ne.s32.totalorder %s167_s3, %s98_s5  ;;  %p102_p0 = scmp.lt.u32.totalorder %s98_s5, %s167_s3 }
  0x1f   :  { %p104_p1 = pnand %p102_p0, %p99_p13 }
  0x21   :  { %107 = shalt.err (!%p104_p1)
}
  0x22   :  { %54 = dma.vmem_to_hbm [thread:$0]  %s52_s25, 32, %s167_s3, [#allocation4]  }
  0x23   :  { %110 = dma.done.wait [#allocation4], 32  }
  0x24   :  { %111 = vsyncadd [#allocation4], 4294967264 }
  0x25   :  { %58 = vsyncpa [#allocation3], 1 }
  0x26   :  { %59 = vsyncpa [#allocation4], 1 }

</bundles_post_ra>
